<compile_context>
chip_gen: v5e
topology: v5e:2x2
jax: 0.10.0
libtpu: 0.0.40
codegen_flags: <defaults>
</compile_context>

<pallas_src>
import functools

import jax
import jax.numpy as jnp
from jax.experimental import pallas as pl
from jax.experimental.pallas import tpu as pltpu

LANES = 128
_MAX_BLOCK_VMEM_BYTES = 40 * 1024 * 1024  # cap: 3 arrays x 2 buffers of f32 blocks


def anfis_kernel(p_ref, x1_ref, x2_ref, o_ref):
    """One lane-dense batch tile (batch element n -> row n//128, lane n%128).

    p_ref  : SMEM f32[11] = [c1_0, c1_1, k1_0, k1_1, c2_0, c2_1, k2_0, k2_1, w0, w1, b]
             with k{m}_j = -0.5 / sigma{m}_j**2 precomputed in the wrapper.
    x1_ref : (TR, 128) feature 0, batch on lanes
    x2_ref : (TR, 128) feature 1, batch on lanes
    o_ref  : (TR, 128) sigmoid output, batch on lanes
    """
    c1a, c1b = p_ref[0], p_ref[1]
    k1a, k1b = p_ref[2], p_ref[3]
    c2a, c2b = p_ref[4], p_ref[5]
    k2a, k2b = p_ref[6], p_ref[7]
    w0, w1, bias = p_ref[8], p_ref[9], p_ref[10]

    x1 = x1_ref[...]
    x2 = x2_ref[...]

    # Rule strengths. exp(a)*exp(b) == exp(a+b): 2 EUP exps per element instead of 4.
    d1a = x1 - c1a
    d2a = x2 - c2a
    d1b = x1 - c1b
    d2b = x2 - c2b
    rule_a = jnp.exp(d1a * d1a * k1a + d2a * d2a * k2a)
    rule_b = jnp.exp(d1b * d1b * k1b + d2b * d2b * k2b)

    # Normalization + Linear(2 -> 1). Approximate EUP reciprocal plus one Newton
    # refinement (rel. error ~eps^2, well inside 1e-5) instead of an exact divide.
    den = rule_a + rule_b + jnp.float32(1e-6)
    inv = pl.reciprocal(den, approx=True)
    inv = inv * (jnp.float32(2.0) - den * inv)
    lin = (rule_a * w0 + rule_b * w1) * inv + bias

    # sigmoid(x) = 0.5 * tanh(0.5 x) + 0.5 : one EUP op, no exp + exact divide tail.
    o_ref[...] = jnp.float32(0.5) * jnp.tanh(jnp.float32(0.5) * lin) + jnp.float32(0.5)


def _choose_tiling(batch, tile_rows):
    """Pick (tile_rows, num_tiles, padded_rows) for the lane-dense (rows, 128) layout.

    Bounds padding waste for unlucky batch sizes and keeps the grid >= 2 (even) when
    there is enough work, so both v7x TensorCores are used via the 'parallel' axis.
    """
    rows = max(1, -(-batch // LANES))
    max_tr = (_MAX_BLOCK_VMEM_BYTES // (6 * LANES * 4)) // 8 * 8
    req = max(8, min(int(tile_rows) // 8 * 8, max_tr))
    if rows <= 16:
        ntiles = 1                          # tiny batch: a single small tile
    else:
        ntiles = max(2, -(-rows // req))
        if ntiles % 2:
            ntiles += 1                     # even grid -> clean 2-TensorCore split
    tr = -(-rows // (8 * ntiles)) * 8       # multiple of 8; keeps padding waste small
    padded_rows = tr * ntiles
    return tr, ntiles, padded_rows


def _vmem_limit_bytes(tr):
    need = 3 * 2 * tr * LANES * 4           # in/out f32 blocks, double-buffered
    return int(min(48 * 1024 * 1024, max(32 * 1024 * 1024, need + (need >> 1))))


def _pack_params(c1, s1, c2, s2, w, b):
    c1 = jnp.asarray(c1, jnp.float32).reshape(2)
    s1 = jnp.asarray(s1, jnp.float32).reshape(2)
    c2 = jnp.asarray(c2, jnp.float32).reshape(2)
    s2 = jnp.asarray(s2, jnp.float32).reshape(2)
    w = jnp.asarray(w, jnp.float32).reshape(2)
    b = jnp.asarray(b, jnp.float32).reshape(1)
    k1 = -0.5 / (s1 * s1)                   # fold Gaussian scale: no divides in-kernel
    k2 = -0.5 / (s2 * s2)
    return jnp.concatenate([c1, k1, c2, k2, w, b])   # f32[11]


def _to_slab(feature_vec, padded_rows):
    pad = padded_rows * LANES - feature_vec.shape[0]
    return jnp.pad(feature_vec, (0, pad)).reshape(padded_rows, LANES)


def _anfis_on_slabs(params, x1, x2, tr):
    padded_rows = x1.shape[0]
    x_spec = pl.BlockSpec((tr, LANES), lambda i: (i, 0))
    return pl.pallas_call(
        anfis_kernel,
        out_shape=jax.ShapeDtypeStruct((padded_rows, LANES), jnp.float32),
        grid_spec=pltpu.PrefetchScalarGridSpec(
            num_scalar_prefetch=0,
            grid=(padded_rows // tr,),
            in_specs=[
                pl.BlockSpec(memory_space=pltpu.MemorySpace.SMEM),  # 11 scalars
                x_spec,                                             # x1 slab
                x_spec,                                             # x2 slab
            ],
            out_specs=pl.BlockSpec((tr, LANES), lambda i: (i, 0)),
        ),
        compiler_params=pltpu.CompilerParams(
            dimension_semantics=("parallel",),
            vmem_limit_bytes=_vmem_limit_bytes(tr),
        ),
    )(params, x1, x2)


@functools.partial(jax.jit, static_argnames=("tile_rows",))
def true_anfis_forward(x, c1, s1, c2, s2, w, b, *, tile_rows=8192):
    """TrueANFIS forward. x: (B, 2) -> (B, 1), matching the PyTorch module."""
    B = x.shape[0]
    tr, _, padded_rows = _choose_tiling(B, tile_rows)
    x = x.astype(jnp.float32)
    # De-interleave (B, 2) into two lane-dense slabs — a single fused XLA pass.
    # TODO(synk): accept feature-major / pre-slabbed inputs upstream (see
    # true_anfis_forward_feature_major) or de-interleave in-kernel (XLU/MXU idle)
    # so the raw interleaved slab can be DMA'd directly and this pass disappears.
    x1 = _to_slab(x[:, 0], padded_rows)
    x2 = _to_slab(x[:, 1], padded_rows)
    out = _anfis_on_slabs(_pack_params(c1, s1, c2, s2, w, b), x1, x2, tr)
    # Slice is a no-op whenever B is tile-aligned (padded_rows * 128 == B).
    return out.reshape(padded_rows * LANES)[:B].reshape(B, 1)


@functools.partial(jax.jit, static_argnames=("tile_rows",))
def true_anfis_forward_feature_major(x_fm, c1, s1, c2, s2, w, b, *, tile_rows=8192):
    """Same forward for feature-major x_fm: (2, B). Each feature row is contiguous,
    so building the lane-dense slabs needs no de-interleave pass (review option (a))."""
    B = x_fm.shape[1]
    tr, _, padded_rows = _choose_tiling(B, tile_rows)
    x_fm = x_fm.astype(jnp.float32)
    x1 = _to_slab(x_fm[0], padded_rows)
    x2 = _to_slab(x_fm[1], padded_rows)
    out = _anfis_on_slabs(_pack_params(c1, s1, c2, s2, w, b), x1, x2, tr)
    return out.reshape(padded_rows * LANES)[:B].reshape(B, 1)


def true_anfis_reference(x, c1, s1, c2, s2, w, b):
    """Pure-JAX reference mirroring the PyTorch module exactly."""
    x1 = x[:, 0:1]
    x2 = x[:, 1:2]
    mf1 = jnp.exp(-0.5 * (x1 - c1) ** 2 / s1 ** 2)
    mf2 = jnp.exp(-0.5 * (x2 - c2) ** 2 / s2 ** 2)
    rule = mf1 * mf2
    norm = rule / (rule.sum(axis=1, keepdims=True) + 1e-6)
    out = norm @ w.reshape(1, 2).T + b.reshape(1,)
    return jax.nn.sigmoid(out)


if __name__ == "__main__":
    key = jax.random.PRNGKey(0)
    kx, kc1, ks1, kc2, ks2, kw, kb = jax.random.split(key, 7)

    # Deterministic "torch.randn"-style parameter init (synthetic weights).
    c1 = jax.random.normal(kc1, (2,), dtype=jnp.float32)
    s1 = jnp.abs(jax.random.normal(ks1, (2,), dtype=jnp.float32)) + 0.1
    c2 = jax.random.normal(kc2, (2,), dtype=jnp.float32)
    s2 = jnp.abs(jax.random.normal(ks2, (2,), dtype=jnp.float32)) + 0.1
    w = jax.random.normal(kw, (1, 2), dtype=jnp.float32) / jnp.sqrt(2.0)
    b = jax.random.normal(kb, (1,), dtype=jnp.float32) * 0.1

    # Small batch, non-multiple batch (padding path), and a multi-tile batch (grid >= 2).
    for B in (8, 300, 4096):
        xb = jax.random.normal(jax.random.fold_in(kx, B), (B, 2), dtype=jnp.float32)
        out = jax.block_until_ready(true_anfis_forward(xb, c1, s1, c2, s2, w, b))
        ref = true_anfis_reference(xb, c1, s1, c2, s2, w, b)
        assert out.shape == (B, 1)
        assert jnp.allclose(out, ref, atol=1e-5, rtol=1e-5), f"mismatch vs reference (B={B})"

    # Feature-major fast path (review option (a)): same numbers, no de-interleave pass.
    xb = jax.random.normal(jax.random.fold_in(kx, 77), (300, 2), dtype=jnp.float32)
    out_fm = jax.block_until_ready(
        true_anfis_forward_feature_major(xb.T, c1, s1, c2, s2, w, b))
    ref = true_anfis_reference(xb, c1, s1, c2, s2, w, b)
    assert jnp.allclose(out_fm, ref, atol=1e-5, rtol=1e-5), "mismatch (feature-major path)"

    print("KERNEL_OK")
</pallas_src>

<mosaic_0001>
module attributes {stable_mosaic.version = 11 : i64} {
  func.func @anfis_kernel(%arg0: i32, %arg1: memref<11xf32, #tpu.memory_space<smem>>, %arg2: memref<8x128xf32, #tpu.memory_space<vmem>>, %arg3: memref<8x128xf32, #tpu.memory_space<vmem>>, %arg4: memref<8x128xf32, #tpu.memory_space<vmem>>) attributes {dimension_semantics = [#tpu.dimension_semantics<parallel>], iteration_bounds = array<i64: 1>, scalar_prefetch = 0 : i64, scratch_operands = 0 : i64, tpu.core_type = #tpu.core_type<tc>, window_params = [{transform_indices = @transform_0, window_bounds = array<i64: 11>}, {transform_indices = @transform_1, window_bounds = array<i64: 8, 128>}, {transform_indices = @transform_2, window_bounds = array<i64: 8, 128>}, {transform_indices = @transform_3, window_bounds = array<i64: 8, 128>}]} {
    %c0 = arith.constant 0 : index
    %0 = memref.load %arg1[%c0] : memref<11xf32, #tpu.memory_space<smem>>
    %c1 = arith.constant 1 : index
    %1 = memref.load %arg1[%c1] : memref<11xf32, #tpu.memory_space<smem>>
    %c2 = arith.constant 2 : index
    %2 = memref.load %arg1[%c2] : memref<11xf32, #tpu.memory_space<smem>>
    %c3 = arith.constant 3 : index
    %3 = memref.load %arg1[%c3] : memref<11xf32, #tpu.memory_space<smem>>
    %c4 = arith.constant 4 : index
    %4 = memref.load %arg1[%c4] : memref<11xf32, #tpu.memory_space<smem>>
    %c5 = arith.constant 5 : index
    %5 = memref.load %arg1[%c5] : memref<11xf32, #tpu.memory_space<smem>>
    %c6 = arith.constant 6 : index
    %6 = memref.load %arg1[%c6] : memref<11xf32, #tpu.memory_space<smem>>
    %c7 = arith.constant 7 : index
    %7 = memref.load %arg1[%c7] : memref<11xf32, #tpu.memory_space<smem>>
    %c8 = arith.constant 8 : index
    %8 = memref.load %arg1[%c8] : memref<11xf32, #tpu.memory_space<smem>>
    %c9 = arith.constant 9 : index
    %9 = memref.load %arg1[%c9] : memref<11xf32, #tpu.memory_space<smem>>
    %c10 = arith.constant 10 : index
    %10 = memref.load %arg1[%c10] : memref<11xf32, #tpu.memory_space<smem>>
    %c0_0 = arith.constant 0 : index
    %c0_1 = arith.constant 0 : index
    %11 = vector.load %arg2[%c0_0, %c0_1] : memref<8x128xf32, #tpu.memory_space<vmem>>, vector<8x128xf32>
    %c0_2 = arith.constant 0 : index
    %c0_3 = arith.constant 0 : index
    %12 = vector.load %arg3[%c0_2, %c0_3] : memref<8x128xf32, #tpu.memory_space<vmem>>, vector<8x128xf32>
    %13 = vector.broadcast %0 : f32 to vector<8x128xf32>
    %14 = arith.subf %11, %13 : vector<8x128xf32>
    %15 = vector.broadcast %4 : f32 to vector<8x128xf32>
    %16 = arith.subf %12, %15 : vector<8x128xf32>
    %17 = vector.broadcast %1 : f32 to vector<8x128xf32>
    %18 = arith.subf %11, %17 : vector<8x128xf32>
    %19 = vector.broadcast %5 : f32 to vector<8x128xf32>
    %20 = arith.subf %12, %19 : vector<8x128xf32>
    %21 = arith.mulf %14, %14 : vector<8x128xf32>
    %22 = vector.broadcast %2 : f32 to vector<8x128xf32>
    %23 = arith.mulf %21, %22 : vector<8x128xf32>
    %24 = arith.mulf %16, %16 : vector<8x128xf32>
    %25 = vector.broadcast %6 : f32 to vector<8x128xf32>
    %26 = arith.mulf %24, %25 : vector<8x128xf32>
    %27 = arith.addf %23, %26 : vector<8x128xf32>
    %28 = math.exp %27 : vector<8x128xf32>
    %29 = arith.mulf %18, %18 : vector<8x128xf32>
    %30 = vector.broadcast %3 : f32 to vector<8x128xf32>
    %31 = arith.mulf %29, %30 : vector<8x128xf32>
    %32 = arith.mulf %20, %20 : vector<8x128xf32>
    %33 = vector.broadcast %7 : f32 to vector<8x128xf32>
    %34 = arith.mulf %32, %33 : vector<8x128xf32>
    %35 = arith.addf %31, %34 : vector<8x128xf32>
    %36 = math.exp %35 : vector<8x128xf32>
    %37 = arith.addf %28, %36 : vector<8x128xf32>
    %cst = arith.constant 9.99999997E-7 : f32
    %38 = vector.broadcast %cst : f32 to vector<8x128xf32>
    %39 = arith.addf %37, %38 : vector<8x128xf32>
    %40 = tpu.reciprocal %39 {approx = true} : vector<8x128xf32> -> vector<8x128xf32>
    %41 = arith.mulf %39, %40 : vector<8x128xf32>
    %cst_4 = arith.constant 2.000000e+00 : f32
    %42 = vector.broadcast %cst_4 : f32 to vector<8x128xf32>
    %43 = arith.subf %42, %41 : vector<8x128xf32>
    %44 = arith.mulf %40, %43 : vector<8x128xf32>
    %45 = vector.broadcast %8 : f32 to vector<8x128xf32>
    %46 = arith.mulf %28, %45 : vector<8x128xf32>
    %47 = vector.broadcast %9 : f32 to vector<8x128xf32>
    %48 = arith.mulf %36, %47 : vector<8x128xf32>
    %49 = arith.addf %46, %48 : vector<8x128xf32>
    %50 = arith.mulf %49, %44 : vector<8x128xf32>
    %51 = vector.broadcast %10 : f32 to vector<8x128xf32>
    %52 = arith.addf %50, %51 : vector<8x128xf32>
    %cst_5 = arith.constant 5.000000e-01 : f32
    %53 = vector.broadcast %cst_5 : f32 to vector<8x128xf32>
    %54 = arith.mulf %53, %52 : vector<8x128xf32>
    %55 = math.tanh %54 : vector<8x128xf32>
    %cst_6 = arith.constant 5.000000e-01 : f32
    %56 = vector.broadcast %cst_6 : f32 to vector<8x128xf32>
    %57 = arith.mulf %56, %55 : vector<8x128xf32>
    %cst_7 = arith.constant 5.000000e-01 : f32
    %58 = vector.broadcast %cst_7 : f32 to vector<8x128xf32>
    %59 = arith.addf %57, %58 : vector<8x128xf32>
    %c0_8 = arith.constant 0 : index
    %c0_9 = arith.constant 0 : index
    %60 = vector.load %arg4[%c0_8, %c0_9] : memref<8x128xf32, #tpu.memory_space<vmem>>, vector<8x128xf32>
    tpu.vector_store %arg4[%c0_8, %c0_9], %59 {strides = array<i32>} : memref<8x128xf32, #tpu.memory_space<vmem>>, vector<8x128xf32>,
    return
  }
  func.func @transform_0(%arg0: i32) -> i32 {
    %c0_i32 = arith.constant 0 : i32
    %c0_i32_0 = arith.constant 0 : i32
    return %c0_i32 : i32
  }
  func.func @transform_1(%arg0: i32) -> (i32, i32) {
    %c0_i32 = arith.constant 0 : i32
    %c0_i32_0 = arith.constant 0 : i32
    return %arg0, %c0_i32 : i32, i32
  }
  func.func @transform_2(%arg0: i32) -> (i32, i32) {
    %c0_i32 = arith.constant 0 : i32
    %c0_i32_0 = arith.constant 0 : i32
    return %arg0, %c0_i32 : i32, i32
  }
  func.func @transform_3(%arg0: i32) -> (i32, i32) {
    %c0_i32 = arith.constant 0 : i32
    %c0_i32_0 = arith.constant 0 : i32
    return %arg0, %c0_i32 : i32, i32
  }
}

</mosaic_0001>

<bundles_post_ra>
// kernel: true_anfis_forward.1
= control target key start
LH: loop header
LB: loop body
LE: loop exit
PB: predicated region body
PF: predicated region fallthrough
CT: control target
= control target key end

     0   :  { %8 = vsyncpa [#allocation3], 0  ;;  %s123_s15 = smov [#allocation2]   ;;  %s156_s0 = inlined_call_operand.vmem [shape: f32[11], index: 0, kind: input, shape index: {}]   ;;  %s157_s1 = inlined_call_operand.vmem [shape: f32[8,128], index: 1, kind: input, shape index: {}]   ;;  %s158_s2 = inlined_call_operand.vmem [shape: f32[8,128], index: 2, kind: input, shape index: {}]   ;;  %s159_s3 = inlined_call_operand.vmem [shape: f32[8,128], index: 3, kind: output, shape index: {}]  }
   0x1   :  { %s14_s14 = sshll.u32 %s156_s0, 4  ;;  %s15_s14 = int_to_ptr.vmem [resolvable:$true] %s14_s14 }
   0x2   :  { %17 = dma.vmem_to_smem %s15_s14, 16, %s123_s15, [#allocation3]  }
   0x3   :  { %121 = dma.done.wait [#allocation3], 16  }
   0x4   :  { %122 = vsyncadd [#allocation3], 4294967280 }
   0x5   :  { %26 = sfence }
   0x6   :  { %s27_s16 = sld [smem:[#allocation2]]  ;;  %v38_v0 = vld [vmem:[%s157_s1] sm:$0xff] }
   0x7   :  { %s90_s17 = sld [smem:[#allocation2 + $0x1]]  ;;  %v39_v4 = vld [vmem:[%s158_s2] sm:$0xff] }
   0x8   :  { %s91_s18 = sld [smem:[#allocation2 + $0x2]] }
   0x9   :  { %s92_s19 = sld [smem:[#allocation2 + $0x3]] }
   0xa   :  { %s93_s20 = sld [smem:[#allocation2 + $0x4]] }
   0xb   :  { %s94_s23 = sld [smem:[#allocation2 + $0x5]] }
   0xc   :  { %s95_s24 = sld [smem:[#allocation2 + $0x6]]  ;;  %v40_v1 = vstv %s27_s16 }
   0xd   :  { %s96_s25 = sld [smem:[#allocation2 + $0x7]]  ;;  %v41_v2 = vsub.f32 %v38_v0, %v40_v1  ;;  %v44_v3 = vstv %s90_s17 }
   0xe   :  { %v45_v5 = vsub.f32 %v38_v0, %v44_v3  ;;  %v49_v8 = vstv %s91_s18  ;;  %s97_s1 = sld [smem:[#allocation2 + $0x8]] }
   0xf   :  { %v48_v6 = vmul.f32 %v41_v2, %v41_v2  ;;  %v58_v12 = vstv %s92_s19  ;;  %s98_s2 = sld [smem:[#allocation2 + $0x9]] }
  0x10   :  { %v42_v7 = vstv %s93_s20  ;;  %v57_v9 = vmul.f32 %v45_v5, %v45_v5  ;;  %s99_s27 = sld [smem:[#allocation2 + $0xa]] }
  0x11   :  { %v43_v10 = vsub.f32 %v39_v4, %v42_v7  ;;  %v46_v11 = vstv %s94_s23  ;;  %v50_v15 = vmul.f32 %v49_v8, %v48_v6 }
  0x12   :  { %v47_v13 = vsub.f32 %v39_v4, %v46_v11  ;;  %v52_v14 = vstv %s95_s24  ;;  %v59_v18 = vmul.f32 %v58_v12, %v57_v9 }
  0x13   :  { %v51_v16 = vmul.f32 %v43_v10, %v43_v10  ;;  %v61_v17 = vstv %s96_s25 }
  0x14   :  { %v60_v19 = vmul.f32 %v47_v13, %v47_v13  ;;  %v72_v30 = vstv %s97_s1 }
  0x15   :  { %v53_v20 = vmul.f32 %v52_v14, %v51_v16  ;;  %v74_v31 = vstv %s98_s2 }
  0x16   :  { %v62_v21 = vmul.f32 %v61_v17, %v60_v19  ;;  %v78_v39 = vstv %s99_s27 }
  0x17   :  { %v54_v22 = vadd.f32 %v53_v20, %v50_v15 }
  0x18   :  { %v63_v23 = vadd.f32 %v62_v21, %v59_v18 }
  0x19   :  { %v55_v24 = vmul.f32 1.442695, %v54_v22 }
  0x1a   :  { %v64_v25 = vmul.f32 1.442695, %v63_v23 }
  0x1b   :  { %101 = vpow2.f32 %v55_v24 }
  0x1c   :  { %103 = vpow2.f32 %v64_v25 }
  0x21   :  { %v102_v26 = vpop.eup %101 }
  0x22   :  { %v104_v27 = vpop.eup %103  ;;  %v73_v32 = vmul.f32 %v102_v26, %v72_v30 }
  0x23   :  { %v66_v28 = vadd.f32 %v104_v27, %v102_v26  ;;  %v75_v33 = vmul.f32 %v104_v27, %v74_v31 }
  0x25   :  { %v67_v29 = vadd.f32 1e-06, %v66_v28  ;;  %v76_v37 = vadd.f32 %v75_v33, %v73_v32 }
  0x27   :  { %105 = vrcp.f32 %v67_v29 }
  0x2d   :  { %v106_v34 = vpop.eup %105 }
  0x2e   :  { %v69_v35 = vmul.f32 %v106_v34, %v67_v29 }
  0x30   :  { %v70_v36 = vsub.f32 2.0, %v69_v35 }
  0x32   :  { %v71_v38 = vmul.f32 %v106_v34, %v70_v36 }
  0x34   :  { %v77_v40 = vmul.f32 %v76_v37, %v71_v38 }
  0x36   :  { %v79_v41 = vadd.f32 %v78_v39, %v77_v40 }
  0x38   :  { %v80_v42 = vmul.f32 0.5, %v79_v41 }
  0x3a   :  { %107 = vtanh.f32 %v80_v42 }
  0x40   :  { %v108_v43 = vpop.eup %107 }
  0x41   :  { %v82_v44 = vmul.f32 0.5, %v108_v43 }
  0x43   :  { %v83_v45 = vadd.f32 0.5, %v82_v44 }
  0x45   :  { %84 = vst [vmem:[%s159_s3] sm:$0xff] %v83_v45 }
  0x46   :  { %89 = vsyncpa [#allocation3], 1 }

</bundles_post_ra>
